<compile_context>
chip_gen: v7x
topology: tpu7x:2x2x1
jax: 0.10.0
libtpu: 0.0.40
codegen_flags: <defaults>
</compile_context>

<pallas_src>
import functools

import jax
import jax.numpy as jnp
from jax.experimental import pallas as pl
from jax.experimental.pallas import tpu as pltpu


_LANE = 128
_SUBLANE = 8
_EPS = 1e-06

# 8 MiB per input block -> 2 inputs x 2 pipeline buffers = 32 MiB working set.
# 48 MiB scoped VMEM fits v7x's 64 MiB physical VMEM and raises the smaller
# default scoped limits on v5e / v6e.
_BLOCK_BYTES = 8 * 1024 * 1024
_VMEM_LIMIT = 48 * 1024 * 1024


def _ceil_to(x: int, m: int) -> int:
    return (x + m - 1) // m * m


def _dice_sums_kernel(x_ref, t_ref, inter_ref, union_ref, *,
                      f_inner, tile_f, feat_len, need_mask):
    j = pl.program_id(2)  # inner feature (reduction) axis — last in the grid

    @pl.when(j == 0)
    def _():
        inter_ref[...] = jnp.zeros_like(inter_ref)
        union_ref[...] = jnp.zeros_like(union_ref)

    x = x_ref[...].astype(jnp.float32)   # (tile_n, tile_f)
    t = t_ref[...].astype(jnp.float32)

    if need_mask:
        # Nominal (unclamped) global feature offset of this tile; lanes at or
        # beyond the true feature length read layout padding / stale data and
        # must contribute exactly 0 to both sums.
        base = (pl.program_id(1) * f_inner + j) * tile_f
        lane = jax.lax.broadcasted_iota(jnp.int32, x.shape, 1)
        valid = (base + lane) < feat_len
        x = jnp.where(valid, x, 0.0)
        t = jnp.where(valid, t, 0.0)

    # Per-sample partial sums over this feature tile (lane reductions).
    inter_ref[...] += jnp.sum(x * t, axis=1, keepdims=True)
    union_ref[...] += (jnp.sum(x, axis=1, keepdims=True)
                       + jnp.sum(t, axis=1, keepdims=True))


def dice_loss(inputs: jax.Array, target: jax.Array, *,
              block_bytes: int = _BLOCK_BYTES) -> jax.Array:
    """Pallas TPU implementation of DiceLoss.forward for NCHW inputs."""
    assert inputs.shape == target.shape
    N, C, H, W = inputs.shape
    F = C * H * W

    x = inputs.reshape(N, F)
    t = target.reshape(N, F)
    itemsize = max(x.dtype.itemsize, t.dtype.itemsize)
    min_item = min(x.dtype.itemsize, t.dtype.itemsize)
    # Sublane granularity of the narrowest dtype (f32:8, bf16:16, int8:32) so
    # the VMEM budget accounts for sublane padding of short blocks.
    sub_gran = _SUBLANE * max(1, 4 // max(1, min_item))

    # ---- Batch tiling: no padding. Block rows == N (full dim, any N) or a
    # multiple of 8. A ragged last batch block only pollutes rows >= N, whose
    # per-sample partial sums land in output rows the wrapper never reads.
    row_bytes = _ceil_to(F, _LANE) * itemsize
    if N <= _SUBLANE or _ceil_to(N, sub_gran) * row_bytes <= block_bytes:
        tile_n = N
    else:
        rows = max(_SUBLANE, (block_bytes // row_bytes) // _SUBLANE * _SUBLANE)
        tile_n = min(rows, N // _SUBLANE * _SUBLANE)
    n_tiles = pl.cdiv(N, tile_n)

    # ---- Feature tiling (lane axis): fill the per-input block byte budget.
    pad_rows = _ceil_to(tile_n, sub_gran)   # VMEM sublane padding of the block
    budget_lanes = max(_LANE,
                       (block_bytes // (pad_rows * itemsize)) // _LANE * _LANE)
    tile_f = F if budget_lanes >= F else budget_lanes   # ==F or multiple of 128
    total_f_tiles = pl.cdiv(F, tile_f)

    # ---- v7x megacore: if the batch yields a single block, split the feature
    # tiles into 2 parallel chunks (each owning its own output block) so both
    # TensorCores get work. Harmless on single-TC chips.
    p_par = 2 if (n_tiles == 1 and total_f_tiles >= 2) else 1
    f_inner = pl.cdiv(total_f_tiles, p_par)

    # Lane mask is needed whenever a (nominal) feature tile extends past F.
    need_mask = (tile_f != F) and (F % tile_f != 0
                                   or p_par * f_inner != total_f_tiles)

    if p_par * f_inner == total_f_tiles:
        def feat_block(p, j):
            return p * f_inner + j
    else:
        # Clamp the overshoot tiles of the last chunk to a valid block index;
        # the in-kernel mask zeroes their (nominally out-of-range) contribution.
        def feat_block(p, j):
            return jnp.minimum(p * f_inner + j, total_f_tiles - 1)

    kernel = functools.partial(
        _dice_sums_kernel,
        f_inner=f_inner, tile_f=tile_f, feat_len=F, need_mask=need_mask)

    out_sd = jax.ShapeDtypeStruct((p_par, N, 1), jnp.float32)
    out_spec = pl.BlockSpec((None, tile_n, 1), lambda i, p, j: (p, i, 0))

    inter_p, union_p = pl.pallas_call(
        kernel,
        out_shape=(out_sd, out_sd),
        grid_spec=pltpu.PrefetchScalarGridSpec(
            num_scalar_prefetch=0,
            grid=(n_tiles, p_par, f_inner),
            in_specs=[
                pl.BlockSpec((tile_n, tile_f),
                             lambda i, p, j: (i, feat_block(p, j))),
                pl.BlockSpec((tile_n, tile_f),
                             lambda i, p, j: (i, feat_block(p, j))),
            ],
            out_specs=(out_spec, out_spec),
        ),
        compiler_params=pltpu.CompilerParams(
            # Batch and feature-chunk axes are independent -> parallel (both
            # TCs usable on v7x); inner feature axis is the reduction.
            dimension_semantics=("parallel", "parallel", "arbitrary"),
            vmem_limit_bytes=_VMEM_LIMIT,
        ),
        cost_estimate=pl.CostEstimate(
            flops=4 * N * F,
            transcendentals=0,
            bytes_accessed=N * F * (x.dtype.itemsize + t.dtype.itemsize)
                           + 2 * p_par * N * 4,
        ),
    )(x, t)

    # Tiny per-sample finalize on N scalars: combine parallel-chunk partials,
    # then dice and mean — negligible next to the streaming kernel.
    inter = jnp.sum(inter_p[:, :, 0], axis=0)   # (N,)
    union = jnp.sum(union_p[:, :, 0], axis=0)   # (N,)
    eps = jnp.float32(_EPS)
    dice = (2.0 * inter + eps) / (union + eps)
    return jnp.mean(1.0 - dice)


def _dice_loss_ref(inputs, target):
    dims = (1, 2, 3)
    intersection = jnp.sum(inputs * target, axis=dims)
    union = jnp.sum(inputs + target, axis=dims)
    dice_score = (2.0 * intersection + _EPS) / (union + _EPS)
    return jnp.mean(1.0 - dice_score)


if __name__ == "__main__":
    key = jax.random.PRNGKey(0)

    def make(shape, k):
        k1, k2 = jax.random.split(k)
        xx = jax.nn.sigmoid(jax.random.normal(k1, shape, dtype=jnp.float32))
        tt = (jax.random.uniform(k2, shape) > 0.5).astype(jnp.float32)
        return xx, tt

    keys = jax.random.split(key, 3)

    # 1) Typical small config with the default (large) block budget:
    #    single block, no padding, no mask.
    x1, t1 = make((2, 4, 16, 16), keys[0])
    out1 = jax.block_until_ready(dice_loss(x1, t1))
    ref1 = jax.block_until_ready(_dice_loss_ref(x1, t1))
    assert jnp.allclose(out1, ref1, atol=1e-5, rtol=1e-5), (out1, ref1)

    # 2) Tiny forced block budget: exercises the feature-tile lane mask, the
    #    clamped index map and the 2-way parallel feature split (v7x path).
    x2, t2 = make((2, 3, 10, 25), keys[1])
    out2 = jax.block_until_ready(dice_loss(x2, t2, block_bytes=8 * 1024))
    ref2 = jax.block_until_ready(_dice_loss_ref(x2, t2))
    assert jnp.allclose(out2, ref2, atol=1e-5, rtol=1e-5), (out2, ref2)

    # 3) Ragged batch (N=10 with 8-row batch tiles) + ragged feature tail.
    x3, t3 = make((10, 3, 10, 25), keys[2])
    out3 = jax.block_until_ready(dice_loss(x3, t3, block_bytes=8 * 1024))
    ref3 = jax.block_until_ready(_dice_loss_ref(x3, t3))
    assert jnp.allclose(out3, ref3, atol=1e-5, rtol=1e-5), (out3, ref3)

    print("KERNEL_OK")
</pallas_src>

<mosaic_0001>
module attributes {stable_mosaic.version = 11 : i64} {
  func.func @_dice_sums_kernel(%arg0: i32, %arg1: i32, %arg2: i32, %arg3: memref<2x1024xf32, #tpu.memory_space<vmem>>, %arg4: memref<2x1024xf32, #tpu.memory_space<vmem>>, %arg5: memref<1x2x1xf32, #tpu.memory_space<vmem>>, %arg6: memref<1x2x1xf32, #tpu.memory_space<vmem>>) attributes {dimension_semantics = [#tpu.dimension_semantics<parallel>, #tpu.dimension_semantics<parallel>, #tpu.dimension_semantics<arbitrary>], iteration_bounds = array<i64: 1, 1, 1>, scalar_prefetch = 0 : i64, scratch_operands = 0 : i64, tpu.core_type = #tpu.core_type<tc>, window_params = [{transform_indices = @transform_0, window_bounds = array<i64: 2, 1024>}, {transform_indices = @transform_1, window_bounds = array<i64: 2, 1024>}, {transform_indices = @transform_2, window_bounds = array<i64: 1, 2, 1>}, {transform_indices = @transform_3, window_bounds = array<i64: 1, 2, 1>}]} {
    %c0_i32 = arith.constant 0 : i32
    %0 = arith.cmpi eq, %arg2, %c0_i32 : i32
    %1 = arith.extui %0 : i1 to i32
    %c0_i32_0 = arith.constant 0 : i32
    %2 = arith.cmpi ne, %1, %c0_i32_0 : i32
    scf.if %2 {
      %cst_18 = arith.constant 0.000000e+00 : f32
      %25 = vector.broadcast %cst_18 : f32 to vector<2x1xf32>
      %c0_19 = arith.constant 0 : index
      %c0_20 = arith.constant 0 : index
      %c0_21 = arith.constant 0 : index
      %26 = vector.load %arg5[%c0_19, %c0_20, %c0_21] : memref<1x2x1xf32, #tpu.memory_space<vmem>>, vector<1x2x1xf32>
      %27 = vector.shape_cast %26 : vector<1x2x1xf32> to vector<2x1xf32>
      %28 = vector.shape_cast %25 : vector<2x1xf32> to vector<1x2x1xf32>
      tpu.vector_store %arg5[%c0_19, %c0_20, %c0_21], %28 {strides = array<i32>} : memref<1x2x1xf32, #tpu.memory_space<vmem>>, vector<1x2x1xf32>,
      %cst_22 = arith.constant 0.000000e+00 : f32
      %29 = vector.broadcast %cst_22 : f32 to vector<2x1xf32>
      %c0_23 = arith.constant 0 : index
      %c0_24 = arith.constant 0 : index
      %c0_25 = arith.constant 0 : index
      %30 = vector.load %arg6[%c0_23, %c0_24, %c0_25] : memref<1x2x1xf32, #tpu.memory_space<vmem>>, vector<1x2x1xf32>
      %31 = vector.shape_cast %30 : vector<1x2x1xf32> to vector<2x1xf32>
      %32 = vector.shape_cast %29 : vector<2x1xf32> to vector<1x2x1xf32>
      tpu.vector_store %arg6[%c0_23, %c0_24, %c0_25], %32 {strides = array<i32>} : memref<1x2x1xf32, #tpu.memory_space<vmem>>, vector<1x2x1xf32>,
    } else {
    }
    %c0 = arith.constant 0 : index
    %c0_1 = arith.constant 0 : index
    %3 = vector.load %arg3[%c0, %c0_1] : memref<2x1024xf32, #tpu.memory_space<vmem>>, vector<2x1024xf32>
    %c0_2 = arith.constant 0 : index
    %c0_3 = arith.constant 0 : index
    %4 = vector.load %arg4[%c0_2, %c0_3] : memref<2x1024xf32, #tpu.memory_space<vmem>>, vector<2x1024xf32>
    %c0_4 = arith.constant 0 : index
    %c0_5 = arith.constant 0 : index
    %c0_6 = arith.constant 0 : index
    %5 = vector.load %arg5[%c0_4, %c0_5, %c0_6] : memref<1x2x1xf32, #tpu.memory_space<vmem>>, vector<1x2x1xf32>
    %6 = vector.shape_cast %5 : vector<1x2x1xf32> to vector<2x1xf32>
    %7 = arith.mulf %3, %4 : vector<2x1024xf32>
    %cst = arith.constant dense<0.000000e+00> : vector<2xf32>
    %8 = vector.multi_reduction <add>, %7, %cst [1] : vector<2x1024xf32> to vector<2xf32>
    %9 = vector.shape_cast %8 : vector<2xf32> to vector<2x1xf32>
    %10 = arith.addf %6, %9 : vector<2x1xf32>
    %c0_7 = arith.constant 0 : index
    %c0_8 = arith.constant 0 : index
    %c0_9 = arith.constant 0 : index
    %11 = vector.load %arg5[%c0_7, %c0_8, %c0_9] : memref<1x2x1xf32, #tpu.memory_space<vmem>>, vector<1x2x1xf32>
    %12 = vector.shape_cast %11 : vector<1x2x1xf32> to vector<2x1xf32>
    %13 = vector.shape_cast %10 : vector<2x1xf32> to vector<1x2x1xf32>
    tpu.vector_store %arg5[%c0_7, %c0_8, %c0_9], %13 {strides = array<i32>} : memref<1x2x1xf32, #tpu.memory_space<vmem>>, vector<1x2x1xf32>,
    %c0_10 = arith.constant 0 : index
    %c0_11 = arith.constant 0 : index
    %c0_12 = arith.constant 0 : index
    %14 = vector.load %arg6[%c0_10, %c0_11, %c0_12] : memref<1x2x1xf32, #tpu.memory_space<vmem>>, vector<1x2x1xf32>
    %15 = vector.shape_cast %14 : vector<1x2x1xf32> to vector<2x1xf32>
    %cst_13 = arith.constant dense<0.000000e+00> : vector<2xf32>
    %16 = vector.multi_reduction <add>, %3, %cst_13 [1] : vector<2x1024xf32> to vector<2xf32>
    %17 = vector.shape_cast %16 : vector<2xf32> to vector<2x1xf32>
    %cst_14 = arith.constant dense<0.000000e+00> : vector<2xf32>
    %18 = vector.multi_reduction <add>, %4, %cst_14 [1] : vector<2x1024xf32> to vector<2xf32>
    %19 = vector.shape_cast %18 : vector<2xf32> to vector<2x1xf32>
    %20 = arith.addf %17, %19 : vector<2x1xf32>
    %21 = arith.addf %15, %20 : vector<2x1xf32>
    %c0_15 = arith.constant 0 : index
    %c0_16 = arith.constant 0 : index
    %c0_17 = arith.constant 0 : index
    %22 = vector.load %arg6[%c0_15, %c0_16, %c0_17] : memref<1x2x1xf32, #tpu.memory_space<vmem>>, vector<1x2x1xf32>
    %23 = vector.shape_cast %22 : vector<1x2x1xf32> to vector<2x1xf32>
    %24 = vector.shape_cast %21 : vector<2x1xf32> to vector<1x2x1xf32>
    tpu.vector_store %arg6[%c0_15, %c0_16, %c0_17], %24 {strides = array<i32>} : memref<1x2x1xf32, #tpu.memory_space<vmem>>, vector<1x2x1xf32>,
    return
  }
  func.func @transform_0(%arg0: i32, %arg1: i32, %arg2: i32) -> (i32, i32) {
    %c1_i32 = arith.constant 1 : i32
    %0 = arith.muli %arg1, %c1_i32 : i32
    %1 = arith.addi %0, %arg2 : i32
    %c0_i32 = arith.constant 0 : i32
    return %arg0, %1 : i32, i32
  }
  func.func @transform_1(%arg0: i32, %arg1: i32, %arg2: i32) -> (i32, i32) {
    %c1_i32 = arith.constant 1 : i32
    %0 = arith.muli %arg1, %c1_i32 : i32
    %1 = arith.addi %0, %arg2 : i32
    %c0_i32 = arith.constant 0 : i32
    return %arg0, %1 : i32, i32
  }
  func.func @transform_2(%arg0: i32, %arg1: i32, %arg2: i32) -> (i32, i32, i32) {
    %c0_i32 = arith.constant 0 : i32
    %c0_i32_0 = arith.constant 0 : i32
    return %arg1, %arg0, %c0_i32 : i32, i32, i32
  }
  func.func @transform_3(%arg0: i32, %arg1: i32, %arg2: i32) -> (i32, i32, i32) {
    %c0_i32 = arith.constant 0 : i32
    %c0_i32_0 = arith.constant 0 : i32
    return %arg1, %arg0, %c0_i32 : i32, i32, i32
  }
}

</mosaic_0001>

<bundles_post_ra>
// kernel: tpu_custom_call.1
= control target key start
LH: loop header
LB: loop body
LE: loop exit
PB: predicated region body
PF: predicated region fallthrough
CT: control target
= control target key end

     0   :  { %9 = vsyncpa [#allocation3], 0  ;;  %s424_s0 = inlined_call_operand.hbm [shape: f32[2,1024], index: 0, kind: input, shape index: {}]   ;;  %s425_s1 = inlined_call_operand.hbm [shape: f32[2,1024], index: 1, kind: input, shape index: {}]   ;;  %s426_s2 = inlined_call_operand.vmem [shape: f32[1,2,1], index: 2, kind: output, shape index: {0}]   ;;  %s427_s3 = inlined_call_operand.vmem [shape: f32[1,2,1], index: 3, kind: output, shape index: {1}]  }
   0x1   :  { %10 = vsyncpa [#allocation5], 0  ;;  %s320_s12 = smov [#allocation2]   ;;  %s321_s14 = smov [#allocation4]  }
   0x2   :  { %s21_s13 = sshll.u32 %s320_s12, 4  ;;  %s35_s15 = sshll.u32 %s321_s14, 4  ;;  %s22_s13 = int_to_ptr.vmem [resolvable:$true] %s21_s13  ;;  %s36_s15 = int_to_ptr.vmem [resolvable:$true] %s35_s15 }
   0x3   :  { %s272_s18 = scalar_lea.hbm %s424_s0, 256 }
   0x4   :  { %p273_p0 = scmp.ne.s32.totalorder %s424_s0, %s272_s18  ;;  %p276_p1 = scmp.lt.u32.totalorder %s272_s18, %s424_s0 }
   0x6   :  { %p278_p2 = pnand %p276_p1, %p273_p0 }
   0x8   :  { %281 = shalt.err (!%p278_p2)
}
   0x9   :  { %s282_s23 = scalar_lea.vmem %s22_s13, 256  ;;  %p287_p4 = scmp.lt.s32.totalorder %s22_s13, %s22_s13 }
   0xa   :  { %p283_p3 = scmp.ne.s32.totalorder %s22_s13, %s282_s23  ;;  %p288_p5 = scmp.lt.s32.totalorder %s282_s23, %s282_s23 }
   0xc   :  { %p289_p6 = por %p288_p5, %p287_p4 }
   0xe   :  { %p290_p7 = pnand %p289_p6, %p283_p3 }
  0x10   :  { %293 = shalt.err (!%p290_p7)
}
  0x11   :  { %24 = dma.hbm_to_vmem [thread:$0]  %s424_s0, 256, %s22_s13, [#allocation3]  }
  0x12   :  { %s294_s28 = scalar_lea.hbm %s425_s1, 256 }
  0x13   :  { %p295_p8 = scmp.ne.s32.totalorder %s425_s1, %s294_s28  ;;  %p298_p9 = scmp.lt.u32.totalorder %s294_s28, %s425_s1 }
  0x15   :  { %p300_p10 = pnand %p298_p9, %p295_p8 }
  0x17   :  { %303 = shalt.err (!%p300_p10)
}
  0x18   :  { %s304_s6 = scalar_lea.vmem %s36_s15, 256  ;;  %p309_p12 = scmp.lt.s32.totalorder %s36_s15, %s36_s15 }
  0x19   :  { %p305_p11 = scmp.ne.s32.totalorder %s36_s15, %s304_s6  ;;  %p310_p13 = scmp.lt.s32.totalorder %s304_s6, %s304_s6 }
  0x1b   :  { %p311_p0 = por %p310_p13, %p309_p12 }
  0x1d   :  { %p312_p1 = pnand %p311_p0, %p305_p11 }
  0x1f   :  { %315 = shalt.err (!%p312_p1)
}
  0x20   :  { %38 = dma.hbm_to_vmem [thread:$0]  %s425_s1, 256, %s36_s15, [#allocation5]  }
  0x21   :  { %316 = dma.done.wait [#allocation3], 256  }
  0x22   :  { %317 = vsyncadd [#allocation3], 4294967040 }
  0x23   :  { %318 = dma.done.wait [#allocation5], 256  }
  0x24   :  { %319 = vsyncadd [#allocation5], 4294967040  ;;  %v69_v0 = vlaneseq  ;;  %v322_v1 = vmov 1983009808   ;;  %v56_v6 = vld [vmem:[#allocation2] sm:$0xff]  ;;  %v57_v7 = vld [vmem:[#allocation2 + $0x8] sm:$0xff] }
  0x25   :  { %v67_v2 = vunpack.c.l.s4 %v322_v1  ;;  %v58_v8 = vld [vmem:[#allocation4] sm:$0xff]  ;;  %vm107_vm0 = vcmask 1041408   ;;  %v131_v9 = vcombine.high %v56_v6, %v56_v6  ;;  %v148_v11 = vcombine.high %v57_v7, %v57_v7  ;;  %v59_v12 = vld [vmem:[#allocation4 + $0x8] sm:$0xff] }
  0x26   :  { %v70_v3 = vshrl.u32 %v69_v0, 7  ;;  %v192_v14 = vcombine.high %v58_v8, %v58_v8  ;;  %v209_v18 = vcombine.high %v59_v12, %v59_v12  ;;  %v61_v43 = vmul.f32 %v58_v8, %v56_v6 }
  0x27   :  { %v68_v4 = vunpack.c.0.s8 %v67_v2  ;;  %v62_v47 = vmul.f32 %v59_v12, %v57_v7  ;;  %vm53_vm1 = vcmask 1024  }
  0x28   :  { %v65_v50 = vcombine.high %v61_v43, %v61_v43 }
  0x29   :  { %v368_v5 = vsub.s32 %v68_v4, %v70_v3  ;;  %v82_v54 = vcombine.high %v62_v47, %v62_v47 }
  0x2b   :  { %v138_v10 = vrot.slane %v56_v6, %v368_v5  ;;  %v155_v13 = vrot.slane %v57_v7, %v368_v5  ;;  %v199_v15 = vrot.slane %v58_v8, %v368_v5  ;;  %v145_v16 = vrot.slane %v131_v9, %v368_v5 }
  0x2c   :  { %v206_v20 = vrot.slane %v192_v14, %v368_v5  ;;  %v216_v22 = vrot.slane %v59_v12, %v368_v5  ;;  %v162_v24 = vrot.slane %v148_v11, %v368_v5  ;;  %v223_v31 = vrot.slane %v209_v18, %v368_v5 }
  0x2d   :  { %v146_v17 = vcombine.high %v138_v10, %v138_v10  ;;  %v173_v19 = vsel %vm107_vm0, %v138_v10, 0.0  ;;  %v207_v21 = vcombine.high %v199_v15, %v199_v15  ;;  %v147_v23 = vcombine.high %v145_v16, %v145_v16 }
  0x2e   :  { %v176_v26 = vsel %vm107_vm0, %v145_v16, 0.0  ;;  %v163_v27 = vcombine.high %v155_v13, %v155_v13  ;;  %v208_v29 = vcombine.high %v206_v20, %v206_v20  ;;  %v234_v33 = vsel %vm107_vm0, %v199_v15, 0.0 }
  0x2f   :  { %v174_v25 = vsel %vm107_vm0, %v146_v17, 0.0  ;;  %v178_v30 = vsel %vm107_vm0, %v147_v23, 0.0  ;;  %v235_v34 = vsel %vm107_vm0, %v207_v21, 0.0  ;;  %v237_v35 = vsel %vm107_vm0, %v206_v20, 0.0 }
  0x30   :  { %v175_v28 = vadd.f32 %v174_v25, %v173_v19  ;;  %v164_v36 = vcombine.high %v162_v24, %v162_v24  ;;  %v180_v37 = vsel %vm107_vm0, %v155_v13, 0.0  ;;  %v224_v38 = vcombine.high %v216_v22, %v216_v22 }
  0x31   :  { %v236_v39 = vadd.f32 %v235_v34, %v234_v33  ;;  %v182_v41 = vsel %vm107_vm0, %v163_v27, 0.0  ;;  %v239_v42 = vsel %vm107_vm0, %v208_v29, 0.0  ;;  %v184_v44 = vsel %vm107_vm0, %v162_v24, 0.0 }
  0x32   :  { %v177_v32 = vadd.f32 %v176_v26, %v175_v28  ;;  %v225_v45 = vcombine.high %v223_v31, %v223_v31  ;;  %v241_v49 = vsel %vm107_vm0, %v216_v22, 0.0  ;;  %v72_v51 = vrot.slane %v61_v43, %v368_v5 }
  0x33   :  { %v238_v46 = vadd.f32 %v237_v35, %v236_v39  ;;  %v243_v53 = vsel %vm107_vm0, %v224_v38, 0.0  ;;  %v89_v55 = vrot.slane %v62_v47, %v368_v5  ;;  %v79_v57 = vrot.slane %v65_v50, %v368_v5 }
  0x34   :  { %v179_v40 = vadd.f32 %v178_v30, %v177_v32  ;;  %v80_v58 = vcombine.high %v72_v51, %v72_v51  ;;  %v108_v59 = vsel %vm107_vm0, %v72_v51, 0.0  ;;  %v186_v60 = vsel %vm107_vm0, %v164_v36, 0.0 }
  0x35   :  { %v240_v52 = vadd.f32 %v239_v42, %v238_v46  ;;  %v245_v62 = vsel %vm107_vm0, %v223_v31, 0.0  ;;  %v81_v0 = vcombine.high %v79_v57, %v79_v57  ;;  %v111_v2 = vsel %vm107_vm0, %v79_v57, 0.0 }
  0x36   :  { %v181_v48 = vadd.f32 %v180_v37, %v179_v40  ;;  %v109_v1 = vsel %vm107_vm0, %v80_v58, 0.0  ;;  %v247_v4 = vsel %vm107_vm0, %v225_v45, 0.0  ;;  %v96_v8 = vrot.slane %v82_v54, %v368_v5 }
  0x37   :  { %v242_v61 = vadd.f32 %v241_v49, %v240_v52  ;;  %v110_v6 = vadd.f32 %v109_v1, %v108_v59  ;;  %v97_v9 = vcombine.high %v89_v55, %v89_v55  ;;  %v113_v10 = vsel %vm107_vm0, %v81_v0, 0.0 }
  0x38   :  { %v183_v56 = vadd.f32 %v182_v41, %v181_v48  ;;  %v115_v13 = vsel %vm107_vm0, %v89_v55, 0.0  ;;  %v98_v16 = vcombine.high %v96_v8, %v96_v8  ;;  %v119_v19 = vsel %vm107_vm0, %v96_v8, 0.0 }
  0x39   :  { %v244_v3 = vadd.f32 %v243_v53, %v242_v61  ;;  %v112_v12 = vadd.f32 %v111_v2, %v110_v6  ;;  %v117_v17 = vsel %vm107_vm0, %v97_v9, 0.0  ;;  %v323_v23 = vmov 0.0  }
  0x3a   :  { %v185_v63 = vadd.f32 %v184_v44, %v183_v56  ;;  %v121_v5 = vsel %vm107_vm0, %v98_v16, 0.0  ;;  %55 = vst.msk [vmem:[%s427_s3] sm:$0x3] %vm53_vm1, %v323_v23  ;;  %54 = vst.msk [vmem:[%s426_s2] sm:$0x3] %vm53_vm1, %v323_v23 }
  0x3b   :  { %v246_v11 = vadd.f32 %v245_v62, %v244_v3  ;;  %v114_v15 = vadd.f32 %v113_v10, %v112_v12 }
  0x3c   :  { %v187_v7 = vadd.f32 %v186_v60, %v185_v63 }
  0x3d   :  { %v248_v14 = vadd.f32 %v247_v4, %v246_v11  ;;  %v116_v18 = vadd.f32 %v115_v13, %v114_v15 }
  0x3e   :  { %188 = vadd.xlane.f32.xlu0 %v187_v7 }
  0x3f   :  { %v118_v20 = vadd.f32 %v117_v17, %v116_v18 }
  0x41   :  { %v120_v21 = vadd.f32 %v119_v19, %v118_v20  ;;  %v128_v26 = vld [vmem:[%s427_s3] sm:$0x3] }
  0x42   :  { %249 = vadd.xlane.f32.xlu0 %v248_v14  ;;  %v60_v29 = vld [vmem:[%s426_s2] sm:$0x3] }
  0x43   :  { %v122_v22 = vadd.f32 %v121_v5, %v120_v21 }
  0x45   :  { %123 = vadd.xlane.f32.xlu1 %v122_v22 }
  0xcb   :  { %v189_v24 = vpop.xlane.xlu0 %188 }
  0xcf   :  { %v250_v25 = vpop.xlane.xlu0 %249 }
  0xd0   :  { %v251_v27 = vadd.f32 %v250_v25, %v189_v24 }
  0xd2   :  { %v252_v28 = vadd.f32 %v251_v27, %v128_v26  ;;  %v124_v30 = vpop.xlane.xlu1 %123 }
  0xd3   :  { %v125_v31 = vadd.f32 %v124_v30, %v60_v29 }
  0xd4   :  { %253 = vst.msk [vmem:[%s427_s3] sm:$0x3] %vm53_vm1, %v252_v28 }
  0xd5   :  { %127 = vst.msk [vmem:[%s426_s2] sm:$0x3] %vm53_vm1, %v125_v31 }
  0xd6   :  { %262 = vsyncpa [#allocation3], 1 }
  0xd7   :  { %263 = vsyncpa [#allocation5], 1 }

</bundles_post_ra>
